<compile_context>
chip_gen: v7x
topology: tpu7x:2x2x1
jax: 0.10.0
libtpu: 0.0.40
codegen_flags: <defaults>
</compile_context>

<pallas_src>
import functools

import jax
import jax.numpy as jnp
from jax.experimental import pallas as pl
from jax.experimental.pallas import tpu as pltpu

# ----------------------------- configuration --------------------------------
# Small, forward-consistent shapes (real module uses dim_llm=4096, pretrain_dim=512).
NUM_ENTITIES = 50       # rows of the pretrained KG embedding table
PRETRAIN_DIM = 32       # KG embedding width  (pretrain_dim)
LLM_DIM      = 128      # dim_llm  (kept a multiple of 128 for lane-dense stores)
NUM_PREFIX   = 1        # num_prefix
EMB_DIM      = NUM_PREFIX * LLM_DIM          # adapter output width
HIDDEN_DIM   = 3 * EMB_DIM                   # adapter hidden width (mlp)
VOCAB_SIZE   = 100      # llama token-embedding vocab (synthetic)
BATCH        = 2
NUM_TOKEN    = 3        # triple_ids.shape[1]  (head, relation, tail)
SEQ_LEN      = 8        # text token sequence length


# --------------------------- tile / VMEM selection ---------------------------
def _select_config(d_in, hidden, d_out, n_pad):
    """Generation-aware tile sizes and VMEM budget.

    v5e/v6e (128 MiB VMEM, 1 TC): tn = d_out, tk as large as fits ~96 MiB.
    v7x     (64 MiB VMEM, 2 TCs): tn = d_out/2 (grid[0]==2 -> one half-W2
            stream per core), tk under a ~48 MiB budget.
    Unknown: conservative 32 MiB budget (same as the previously-clean run).
    """
    kind = ""
    try:
        kind = jax.devices()[0].device_kind.lower()
    except Exception:
        pass
    is_v7 = "v7" in kind
    is_v5_v6 = ("v5" in kind or "v6" in kind) and not is_v7

    if is_v7:
        vmem_limit = 48 * 1024 * 1024
    elif is_v5_v6:
        vmem_limit = 96 * 1024 * 1024
    else:
        vmem_limit = 32 * 1024 * 1024

    # Output tiling: split D_out across the 2 TensorCores only on v7x.
    if is_v7 and d_out % 256 == 0:
        tn = d_out // 2
    else:
        tn = d_out

    fit_budget = (vmem_limit * 3) // 4   # headroom for the pipeline / compiler

    def vmem_bytes(tk):
        w1_t = 2 * d_in * tk * 2           # double-buffered bf16 W1 tiles
        w2_t = 2 * tk * tn * 2             # double-buffered bf16 W2 tiles
        bias = 2 * (tk + tn) * 4           # b1 / b2 tiles
        out_t = 2 * n_pad * tn * 4         # f32 output block (accumulator)
        scratch = n_pad * d_in * (4 + 2)   # gathered x (f32) + bf16 copy
        return w1_t + w2_t + bias + out_t + scratch

    tk = None
    for cand in (hidden, 8192, 4096, 2048, 1024, 512, 256, 128):
        if cand <= hidden and hidden % cand == 0 and (cand % 8 == 0 or cand == hidden):
            if vmem_bytes(cand) <= fit_budget:
                tk = cand
                break
    if tk is None:
        tk = 128 if hidden % 128 == 0 else hidden

    return tn, tk, vmem_limit


# ------------------------------ Pallas kernel --------------------------------
def _fused_kg_mlp_kernel(ids_ref,                    # scalar prefetch: (n_rows,) int32 in SMEM
                         kg_ref,                     # (num_entities, d_in) f32 in HBM (pl.ANY)
                         w1_ref, b1_ref,             # (d_in, tk) bf16, (1, tk) f32
                         w2_ref, b2_ref,             # (tk, tn) bf16,  (1, tn) f32
                         o_ref,                      # (n_pad, tn) f32  (VMEM-resident accumulator)
                         x_ref, xb_ref, sems,        # scratch: f32 rows, bf16 rows, DMA sems
                         *, n_rows):
    """Fused: gather KG rows, then y = relu(x @ W1 + b1) @ W2 + b2, tiled over
    (D_out, hidden) with the hidden axis as the trailing reduction axis."""
    k = pl.program_id(1)
    n_k = pl.num_programs(1)
    n_pad, d_in = x_ref.shape

    @pl.when(k == 0)
    def _init():
        # Runs once per D_out tile (at most 2 tiles; on v7x those tiles are on
        # different TensorCores, each of which needs its own gathered copy).
        if n_pad > n_rows:
            x_ref[pl.ds(n_rows, n_pad - n_rows), :] = jnp.zeros(
                (n_pad - n_rows, d_in), x_ref.dtype)
        # DMA-gather the KG rows for this batch of triples into VMEM.
        # TODO(synk): at large n_rows, replace the per-row descriptors with a
        # coalesced / Element-indexed gather; at n_rows=6 (2 KiB rows) it's fine.
        for r in range(n_rows):
            pltpu.make_async_copy(kg_ref.at[pl.ds(ids_ref[r], 1), :],
                                  x_ref.at[pl.ds(r, 1), :],
                                  sems.at[r]).start()
        for r in range(n_rows):
            pltpu.make_async_copy(kg_ref.at[pl.ds(ids_ref[r], 1), :],
                                  x_ref.at[pl.ds(r, 1), :],
                                  sems.at[r]).wait()
        # Cast the gathered rows to bf16 exactly once (MXU input).
        xb_ref[...] = x_ref[...].astype(jnp.bfloat16)
        # o_ref's block index is constant across k -> it stays VMEM-resident,
        # so we accumulate directly into it (no separate acc scratch).
        o_ref[...] = jnp.zeros_like(o_ref)

    # First matmul on the current hidden tile: bf16 MXU inputs, f32 accumulation,
    # bias + ReLU in f32 (v5e-safe), then cast to bf16 for the second MXU pass.
    h = jnp.dot(xb_ref[...], w1_ref[...],
                preferred_element_type=jnp.float32) + b1_ref[...]
    h = jnp.maximum(h, 0.0).astype(jnp.bfloat16)
    o_ref[...] += jnp.dot(h, w2_ref[...], preferred_element_type=jnp.float32)

    @pl.when(k == n_k - 1)
    def _finalize():
        # b2 added exactly once, at the final reduction step.
        o_ref[...] += b2_ref[...]


def kg_mlp_adapter(ids, kg_emb, w1, b1, w2, b2, *, tn=None, tk=None):
    """Fused KG gather + MLP adapter.

    ids:    (n_rows,) int32 entity ids (flattened triple ids)
    kg_emb: (num_entities, d_in) f32   frozen KG table (stays in HBM)
    w1:     (d_in, hidden)  bf16       b1: (1, hidden)  f32
    w2:     (hidden, d_out) bf16       b2: (1, d_out)   f32
    returns (n_rows, d_out) f32
    """
    n_rows = ids.shape[0]
    n_pad = max(8, ((n_rows + 7) // 8) * 8)          # sublane-aligned activation rows
    d_in = kg_emb.shape[1]
    hidden = w1.shape[1]
    d_out = w2.shape[1]

    auto_tn, auto_tk, vmem_limit = _select_config(d_in, hidden, d_out, n_pad)
    tn = auto_tn if tn is None else min(tn, d_out)
    tk = auto_tk if tk is None else min(tk, hidden)

    assert d_out % tn == 0 and hidden % tk == 0, "tile sizes must divide dims"
    assert tn % 128 == 0 or tn == d_out, "output tile must be lane-dense or full"
    assert w2.shape[0] == hidden and b1.shape == (1, hidden) and b2.shape == (1, d_out)

    grid = (d_out // tn, hidden // tk)               # (parallel, reduction)

    flops = 2 * n_pad * (d_in * hidden + hidden * d_out)
    bytes_accessed = (n_rows * d_in * 4
                      + w1.size * w1.dtype.itemsize + w2.size * w2.dtype.itemsize
                      + b1.size * 4 + b2.size * 4
                      + n_pad * d_out * 4)

    kernel = functools.partial(_fused_kg_mlp_kernel, n_rows=n_rows)

    out = pl.pallas_call(
        kernel,
        out_shape=jax.ShapeDtypeStruct((n_pad, d_out), jnp.float32),
        grid_spec=pltpu.PrefetchScalarGridSpec(
            num_scalar_prefetch=1,
            grid=grid,
            in_specs=[
                pl.BlockSpec(memory_space=pl.ANY),                        # KG table in HBM
                pl.BlockSpec((d_in, tk), lambda j, k, ids_r: (0, k)),     # W1 hidden tile
                pl.BlockSpec((1, tk),    lambda j, k, ids_r: (0, k)),     # b1 hidden tile
                pl.BlockSpec((tk, tn),   lambda j, k, ids_r: (k, j)),     # W2 (hidden, out) tile
                pl.BlockSpec((1, tn),    lambda j, k, ids_r: (0, j)),     # b2 out tile
            ],
            out_specs=pl.BlockSpec((n_pad, tn), lambda j, k, ids_r: (0, j)),
            scratch_shapes=[
                pltpu.VMEM((n_pad, d_in), jnp.float32),    # gathered KG rows (f32)
                pltpu.VMEM((n_pad, d_in), jnp.bfloat16),   # bf16 copy (cast once)
                pltpu.SemaphoreType.DMA((n_rows,)),        # gather semaphores
            ]),
        compiler_params=pltpu.CompilerParams(
            dimension_semantics=("parallel", "arbitrary"),   # D_out axis across 2 TCs on v7x
            vmem_limit_bytes=vmem_limit),                    # generation-aware budget
        cost_estimate=pl.CostEstimate(flops=flops, transcendentals=0,
                                      bytes_accessed=bytes_accessed),
    )(ids, kg_emb, w1, b1, w2, b2)
    return out[:n_rows]


# ------------------------------ model wrapper --------------------------------
def init_params(key):
    k1, k2, k3, k4 = jax.random.split(key, 4)
    return {
        # frozen pretrained KG entity embeddings (torch.load(...) stand-in)
        "kg_emb": jax.random.normal(k1, (NUM_ENTITIES, PRETRAIN_DIM), jnp.float32),
        # frozen llama token embeddings (llama_model.model.embed_tokens)
        "tok_emb": jax.random.normal(k2, (VOCAB_SIZE, LLM_DIM), jnp.float32),
        # adapter = Linear(pretrain_dim, 3*emb_dim) -> ReLU -> Linear(3*emb_dim, emb_dim)
        # stored (in, out) and in bf16 (halves weight HBM traffic; f32 accumulation in-kernel)
        "w1": (0.02 * jax.random.normal(k3, (PRETRAIN_DIM, HIDDEN_DIM))).astype(jnp.bfloat16),
        "b1": jnp.zeros((1, HIDDEN_DIM), jnp.float32),
        "w2": (0.02 * jax.random.normal(k4, (HIDDEN_DIM, EMB_DIM))).astype(jnp.bfloat16),
        "b2": jnp.zeros((1, EMB_DIM), jnp.float32),
    }


@jax.jit
def knowledge_prompting_forward(params, input_ids, labels, embedding_ids):
    """Mirrors KnowledgePrompting.forward up to (and excluding) the LLaMA call.

    Returns (inputs_embeds, new_labels) exactly as they would be handed to
    self.llama_model(...).
    """
    batch_size, _ = embedding_ids.shape

    # --- PretrainKGEmbedding.forward ------------------------------------------
    # with torch.no_grad(): emb = self.embeddings(ent)   -> gather fused in-kernel
    ent = embedding_ids.reshape(-1).astype(jnp.int32)                  # (B*T,)
    kg_table = jax.lax.stop_gradient(params["kg_emb"])                 # frozen table
    prefix_flat = kg_mlp_adapter(ent, kg_table,
                                 params["w1"], params["b1"],
                                 params["w2"], params["b2"])           # (B*T, emb_dim)
    kg_embeds = prefix_flat.reshape(batch_size, -1, LLM_DIM)           # (B, T*num_prefix, llm_dim)

    # --- KnowledgePrompting.forward -------------------------------------------
    prefix_len = kg_embeds.shape[1]
    token_embeds = jnp.take(params["tok_emb"], input_ids, axis=0)      # (B, S, llm_dim)
    # TODO(synk): writing the adapter output directly into the prefix slice of a
    # pre-allocated inputs_embeds buffer (input_output_aliases) is skipped because
    # the prefix length (T*num_prefix = 3) is not sublane-aligned; concat left to XLA.
    input_embeds = jnp.concatenate((kg_embeds, token_embeds), axis=1)

    prefix_labels = jnp.full((batch_size, prefix_len), -100, dtype=labels.dtype)
    new_labels = jnp.concatenate((prefix_labels, labels), axis=-1)

    # TODO(synk): the frozen LlamaForCausalLM forward (self.llama_model(...)) has no
    # clean single-kernel Pallas equivalent; we return the tensors fed to it.
    return input_embeds, new_labels


# ----------------------------------- main -------------------------------------
if __name__ == "__main__":
    root = jax.random.PRNGKey(0)
    kparam, kid, ktok, klab = jax.random.split(root, 4)
    params = init_params(kparam)

    embedding_ids = jax.random.randint(kid, (BATCH, NUM_TOKEN), 0, NUM_ENTITIES, jnp.int32)
    input_ids = jax.random.randint(ktok, (BATCH, SEQ_LEN), 0, VOCAB_SIZE, jnp.int32)
    labels = jax.random.randint(klab, (BATCH, SEQ_LEN), 0, VOCAB_SIZE, jnp.int32)

    input_embeds, new_labels = knowledge_prompting_forward(
        params, input_ids, labels, embedding_ids)
    jax.block_until_ready((input_embeds, new_labels))

    # shape / semantics checks
    assert input_embeds.shape == (BATCH, NUM_TOKEN * NUM_PREFIX + SEQ_LEN, LLM_DIM)
    assert new_labels.shape == (BATCH, NUM_TOKEN * NUM_PREFIX + SEQ_LEN)
    assert bool(jnp.all(new_labels[:, :NUM_TOKEN * NUM_PREFIX] == -100))

    # numerical check against a pure-JAX reference (same bf16 weight precision)
    ent = embedding_ids.reshape(-1)
    x = jnp.take(params["kg_emb"], ent, axis=0).astype(jnp.bfloat16)
    h = jnp.dot(x, params["w1"], preferred_element_type=jnp.float32) + params["b1"]
    h = jnp.maximum(h, 0.0).astype(jnp.bfloat16)
    y = jnp.dot(h, params["w2"], preferred_element_type=jnp.float32) + params["b2"]
    ref_prefix = y.reshape(BATCH, -1, LLM_DIM)
    assert jnp.allclose(input_embeds[:, :NUM_TOKEN * NUM_PREFIX, :], ref_prefix,
                        atol=1e-2, rtol=1e-2)

    print("KERNEL_OK")
</pallas_src>

<mosaic_0001>
module attributes {stable_mosaic.version = 11 : i64} {
  func.func @_fused_kg_mlp_kernel(%arg0: i32, %arg1: i32, %arg2: memref<6xi32, #tpu.memory_space<smem>>, %arg3: memref<50x32xf32, #tpu.memory_space<any>>, %arg4: memref<32x384xbf16, #tpu.memory_space<vmem>>, %arg5: memref<1x384xf32, #tpu.memory_space<vmem>>, %arg6: memref<384x128xbf16, #tpu.memory_space<vmem>>, %arg7: memref<1x128xf32, #tpu.memory_space<vmem>>, %arg8: memref<8x128xf32, #tpu.memory_space<vmem>>, %arg9: memref<8x32xf32, #tpu.memory_space<vmem>>, %arg10: memref<8x32xbf16, #tpu.memory_space<vmem>>, %arg11: memref<6x!tpu.dma_semaphore, #tpu.memory_space<semaphore_mem>>) attributes {dimension_semantics = [#tpu.dimension_semantics<parallel>, #tpu.dimension_semantics<arbitrary>], iteration_bounds = array<i64: 1, 1>, scalar_prefetch = 1 : i64, scratch_operands = 3 : i64, tpu.core_type = #tpu.core_type<tc>, window_params = [{}, {transform_indices = @transform_1, window_bounds = array<i64: 32, 384>}, {transform_indices = @transform_2, window_bounds = array<i64: 1, 384>}, {transform_indices = @transform_3, window_bounds = array<i64: 384, 128>}, {transform_indices = @transform_4, window_bounds = array<i64: 1, 128>}, {transform_indices = @transform_5, window_bounds = array<i64: 8, 128>}]} {
    %c0_i32 = arith.constant 0 : i32
    %0 = arith.cmpi eq, %arg1, %c0_i32 : i32
    %1 = arith.extui %0 : i1 to i32
    %c0_i32_0 = arith.constant 0 : i32
    %2 = arith.cmpi ne, %1, %c0_i32_0 : i32
    scf.if %2 {
      %cst_16 = arith.constant 0.000000e+00 : f32
      %20 = vector.broadcast %cst_16 : f32 to vector<2x32xf32>
      %c6 = arith.constant 6 : index
      %c0_17 = arith.constant 0 : index
      %21 = vector.load %arg9[%c6, %c0_17] : memref<8x32xf32, #tpu.memory_space<vmem>>, vector<2x32xf32>
      tpu.vector_store %arg9[%c6, %c0_17], %20 {strides = array<i32>} : memref<8x32xf32, #tpu.memory_space<vmem>>, vector<2x32xf32>,
      %c0_18 = arith.constant 0 : index
      %22 = memref.load %arg2[%c0_18] : memref<6xi32, #tpu.memory_space<smem>>
      %c0_i32_19 = arith.constant 0 : i32
      %c0_i32_20 = arith.constant 0 : i32
      %23 = tpu.memref_slice %arg3[%22, %c0_i32_20] : memref<50x32xf32, #tpu.memory_space<any>> -> memref<1x32xf32, #tpu.memory_space<any>>
      %c0_i32_21 = arith.constant 0 : i32
      %c0_i32_22 = arith.constant 0 : i32
      %24 = tpu.memref_slice %arg9[%c0_i32_21, %c0_i32_22] : memref<8x32xf32, #tpu.memory_space<vmem>> -> memref<1x32xf32, #tpu.memory_space<vmem>>
      %25 = tpu.memref_slice %arg11[%c0_i32_19] : memref<6x!tpu.dma_semaphore, #tpu.memory_space<semaphore_mem>> -> memref<1x!tpu.dma_semaphore, #tpu.memory_space<semaphore_mem>>
      %26 = tpu.memref_squeeze %25 : memref<1x!tpu.dma_semaphore, #tpu.memory_space<semaphore_mem>> -> memref<!tpu.dma_semaphore, #tpu.memory_space<semaphore_mem>>
      tpu.enqueue_dma source(%23 : memref<1x32xf32, #tpu.memory_space<any>>) target(%24 : memref<1x32xf32, #tpu.memory_space<vmem>>) target_semaphore(%26 : memref<!tpu.dma_semaphore, #tpu.memory_space<semaphore_mem>>)
      %c1 = arith.constant 1 : index
      %27 = memref.load %arg2[%c1] : memref<6xi32, #tpu.memory_space<smem>>
      %c1_i32 = arith.constant 1 : i32
      %c0_i32_23 = arith.constant 0 : i32
      %28 = tpu.memref_slice %arg3[%27, %c0_i32_23] : memref<50x32xf32, #tpu.memory_space<any>> -> memref<1x32xf32, #tpu.memory_space<any>>
      %c1_i32_24 = arith.constant 1 : i32
      %c0_i32_25 = arith.constant 0 : i32
      %29 = tpu.memref_slice %arg9[%c1_i32_24, %c0_i32_25] : memref<8x32xf32, #tpu.memory_space<vmem>> -> memref<1x32xf32, #tpu.memory_space<vmem>>
      %30 = tpu.memref_slice %arg11[%c1_i32] : memref<6x!tpu.dma_semaphore, #tpu.memory_space<semaphore_mem>> -> memref<1x!tpu.dma_semaphore, #tpu.memory_space<semaphore_mem>>
      %31 = tpu.memref_squeeze %30 : memref<1x!tpu.dma_semaphore, #tpu.memory_space<semaphore_mem>> -> memref<!tpu.dma_semaphore, #tpu.memory_space<semaphore_mem>>
      tpu.enqueue_dma source(%28 : memref<1x32xf32, #tpu.memory_space<any>>) target(%29 : memref<1x32xf32, #tpu.memory_space<vmem>>) target_semaphore(%31 : memref<!tpu.dma_semaphore, #tpu.memory_space<semaphore_mem>>)
      %c2 = arith.constant 2 : index
      %32 = memref.load %arg2[%c2] : memref<6xi32, #tpu.memory_space<smem>>
      %c2_i32 = arith.constant 2 : i32
      %c0_i32_26 = arith.constant 0 : i32
      %33 = tpu.memref_slice %arg3[%32, %c0_i32_26] : memref<50x32xf32, #tpu.memory_space<any>> -> memref<1x32xf32, #tpu.memory_space<any>>
      %c2_i32_27 = arith.constant 2 : i32
      %c0_i32_28 = arith.constant 0 : i32
      %34 = tpu.memref_slice %arg9[%c2_i32_27, %c0_i32_28] : memref<8x32xf32, #tpu.memory_space<vmem>> -> memref<1x32xf32, #tpu.memory_space<vmem>>
      %35 = tpu.memref_slice %arg11[%c2_i32] : memref<6x!tpu.dma_semaphore, #tpu.memory_space<semaphore_mem>> -> memref<1x!tpu.dma_semaphore, #tpu.memory_space<semaphore_mem>>
      %36 = tpu.memref_squeeze %35 : memref<1x!tpu.dma_semaphore, #tpu.memory_space<semaphore_mem>> -> memref<!tpu.dma_semaphore, #tpu.memory_space<semaphore_mem>>
      tpu.enqueue_dma source(%33 : memref<1x32xf32, #tpu.memory_space<any>>) target(%34 : memref<1x32xf32, #tpu.memory_space<vmem>>) target_semaphore(%36 : memref<!tpu.dma_semaphore, #tpu.memory_space<semaphore_mem>>)
      %c3 = arith.constant 3 : index
      %37 = memref.load %arg2[%c3] : memref<6xi32, #tpu.memory_space<smem>>
      %c3_i32 = arith.constant 3 : i32
      %c0_i32_29 = arith.constant 0 : i32
      %38 = tpu.memref_slice %arg3[%37, %c0_i32_29] : memref<50x32xf32, #tpu.memory_space<any>> -> memref<1x32xf32, #tpu.memory_space<any>>
      %c3_i32_30 = arith.constant 3 : i32
      %c0_i32_31 = arith.constant 0 : i32
      %39 = tpu.memref_slice %arg9[%c3_i32_30, %c0_i32_31] : memref<8x32xf32, #tpu.memory_space<vmem>> -> memref<1x32xf32, #tpu.memory_space<vmem>>
      %40 = tpu.memref_slice %arg11[%c3_i32] : memref<6x!tpu.dma_semaphore, #tpu.memory_space<semaphore_mem>> -> memref<1x!tpu.dma_semaphore, #tpu.memory_space<semaphore_mem>>
      %41 = tpu.memref_squeeze %40 : memref<1x!tpu.dma_semaphore, #tpu.memory_space<semaphore_mem>> -> memref<!tpu.dma_semaphore, #tpu.memory_space<semaphore_mem>>
      tpu.enqueue_dma source(%38 : memref<1x32xf32, #tpu.memory_space<any>>) target(%39 : memref<1x32xf32, #tpu.memory_space<vmem>>) target_semaphore(%41 : memref<!tpu.dma_semaphore, #tpu.memory_space<semaphore_mem>>)
      %c4 = arith.constant 4 : index
      %42 = memref.load %arg2[%c4] : memref<6xi32, #tpu.memory_space<smem>>
      %c4_i32 = arith.constant 4 : i32
      %c0_i32_32 = arith.constant 0 : i32
      %43 = tpu.memref_slice %arg3[%42, %c0_i32_32] : memref<50x32xf32, #tpu.memory_space<any>> -> memref<1x32xf32, #tpu.memory_space<any>>
      %c4_i32_33 = arith.constant 4 : i32
      %c0_i32_34 = arith.constant 0 : i32
      %44 = tpu.memref_slice %arg9[%c4_i32_33, %c0_i32_34] : memref<8x32xf32, #tpu.memory_space<vmem>> -> memref<1x32xf32, #tpu.memory_space<vmem>>
      %45 = tpu.memref_slice %arg11[%c4_i32] : memref<6x!tpu.dma_semaphore, #tpu.memory_space<semaphore_mem>> -> memref<1x!tpu.dma_semaphore, #tpu.memory_space<semaphore_mem>>
      %46 = tpu.memref_squeeze %45 : memref<1x!tpu.dma_semaphore, #tpu.memory_space<semaphore_mem>> -> memref<!tpu.dma_semaphore, #tpu.memory_space<semaphore_mem>>
      tpu.enqueue_dma source(%43 : memref<1x32xf32, #tpu.memory_space<any>>) target(%44 : memref<1x32xf32, #tpu.memory_space<vmem>>) target_semaphore(%46 : memref<!tpu.dma_semaphore, #tpu.memory_space<semaphore_mem>>)
      %c5 = arith.constant 5 : index
      %47 = memref.load %arg2[%c5] : memref<6xi32, #tpu.memory_space<smem>>
      %c5_i32 = arith.constant 5 : i32
      %c0_i32_35 = arith.constant 0 : i32
      %48 = tpu.memref_slice %arg3[%47, %c0_i32_35] : memref<50x32xf32, #tpu.memory_space<any>> -> memref<1x32xf32, #tpu.memory_space<any>>
      %c5_i32_36 = arith.constant 5 : i32
      %c0_i32_37 = arith.constant 0 : i32
      %49 = tpu.memref_slice %arg9[%c5_i32_36, %c0_i32_37] : memref<8x32xf32, #tpu.memory_space<vmem>> -> memref<1x32xf32, #tpu.memory_space<vmem>>
      %50 = tpu.memref_slice %arg11[%c5_i32] : memref<6x!tpu.dma_semaphore, #tpu.memory_space<semaphore_mem>> -> memref<1x!tpu.dma_semaphore, #tpu.memory_space<semaphore_mem>>
      %51 = tpu.memref_squeeze %50 : memref<1x!tpu.dma_semaphore, #tpu.memory_space<semaphore_mem>> -> memref<!tpu.dma_semaphore, #tpu.memory_space<semaphore_mem>>
      tpu.enqueue_dma source(%48 : memref<1x32xf32, #tpu.memory_space<any>>) target(%49 : memref<1x32xf32, #tpu.memory_space<vmem>>) target_semaphore(%51 : memref<!tpu.dma_semaphore, #tpu.memory_space<semaphore_mem>>)
      %c0_38 = arith.constant 0 : index
      %52 = memref.load %arg2[%c0_38] : memref<6xi32, #tpu.memory_space<smem>>
      %c0_i32_39 = arith.constant 0 : i32
      %c0_i32_40 = arith.constant 0 : i32
      %53 = tpu.memref_slice %arg3[%52, %c0_i32_40] : memref<50x32xf32, #tpu.memory_space<any>> -> memref<1x32xf32, #tpu.memory_space<any>>
      %c0_i32_41 = arith.constant 0 : i32
      %c0_i32_42 = arith.constant 0 : i32
      %54 = tpu.memref_slice %arg9[%c0_i32_41, %c0_i32_42] : memref<8x32xf32, #tpu.memory_space<vmem>> -> memref<1x32xf32, #tpu.memory_space<vmem>>
      %55 = tpu.memref_slice %arg11[%c0_i32_39] : memref<6x!tpu.dma_semaphore, #tpu.memory_space<semaphore_mem>> -> memref<1x!tpu.dma_semaphore, #tpu.memory_space<semaphore_mem>>
      %56 = tpu.memref_squeeze %55 : memref<1x!tpu.dma_semaphore, #tpu.memory_space<semaphore_mem>> -> memref<!tpu.dma_semaphore, #tpu.memory_space<semaphore_mem>>
      tpu.wait_dma2 semaphore(%56 : memref<!tpu.dma_semaphore, #tpu.memory_space<semaphore_mem>>) src(%53 : memref<1x32xf32, #tpu.memory_space<any>>) dst(%54 : memref<1x32xf32, #tpu.memory_space<vmem>>)
      %c1_43 = arith.constant 1 : index
      %57 = memref.load %arg2[%c1_43] : memref<6xi32, #tpu.memory_space<smem>>
      %c1_i32_44 = arith.constant 1 : i32
      %c0_i32_45 = arith.constant 0 : i32
      %58 = tpu.memref_slice %arg3[%57, %c0_i32_45] : memref<50x32xf32, #tpu.memory_space<any>> -> memref<1x32xf32, #tpu.memory_space<any>>
      %c1_i32_46 = arith.constant 1 : i32
      %c0_i32_47 = arith.constant 0 : i32
      %59 = tpu.memref_slice %arg9[%c1_i32_46, %c0_i32_47] : memref<8x32xf32, #tpu.memory_space<vmem>> -> memref<1x32xf32, #tpu.memory_space<vmem>>
      %60 = tpu.memref_slice %arg11[%c1_i32_44] : memref<6x!tpu.dma_semaphore, #tpu.memory_space<semaphore_mem>> -> memref<1x!tpu.dma_semaphore, #tpu.memory_space<semaphore_mem>>
      %61 = tpu.memref_squeeze %60 : memref<1x!tpu.dma_semaphore, #tpu.memory_space<semaphore_mem>> -> memref<!tpu.dma_semaphore, #tpu.memory_space<semaphore_mem>>
      tpu.wait_dma2 semaphore(%61 : memref<!tpu.dma_semaphore, #tpu.memory_space<semaphore_mem>>) src(%58 : memref<1x32xf32, #tpu.memory_space<any>>) dst(%59 : memref<1x32xf32, #tpu.memory_space<vmem>>)
      %c2_48 = arith.constant 2 : index
      %62 = memref.load %arg2[%c2_48] : memref<6xi32, #tpu.memory_space<smem>>
      %c2_i32_49 = arith.constant 2 : i32
      %c0_i32_50 = arith.constant 0 : i32
      %63 = tpu.memref_slice %arg3[%62, %c0_i32_50] : memref<50x32xf32, #tpu.memory_space<any>> -> memref<1x32xf32, #tpu.memory_space<any>>
      %c2_i32_51 = arith.constant 2 : i32
      %c0_i32_52 = arith.constant 0 : i32
      %64 = tpu.memref_slice %arg9[%c2_i32_51, %c0_i32_52] : memref<8x32xf32, #tpu.memory_space<vmem>> -> memref<1x32xf32, #tpu.memory_space<vmem>>
      %65 = tpu.memref_slice %arg11[%c2_i32_49] : memref<6x!tpu.dma_semaphore, #tpu.memory_space<semaphore_mem>> -> memref<1x!tpu.dma_semaphore, #tpu.memory_space<semaphore_mem>>
      %66 = tpu.memref_squeeze %65 : memref<1x!tpu.dma_semaphore, #tpu.memory_space<semaphore_mem>> -> memref<!tpu.dma_semaphore, #tpu.memory_space<semaphore_mem>>
      tpu.wait_dma2 semaphore(%66 : memref<!tpu.dma_semaphore, #tpu.memory_space<semaphore_mem>>) src(%63 : memref<1x32xf32, #tpu.memory_space<any>>) dst(%64 : memref<1x32xf32, #tpu.memory_space<vmem>>)
      %c3_53 = arith.constant 3 : index
      %67 = memref.load %arg2[%c3_53] : memref<6xi32, #tpu.memory_space<smem>>
      %c3_i32_54 = arith.constant 3 : i32
      %c0_i32_55 = arith.constant 0 : i32
      %68 = tpu.memref_slice %arg3[%67, %c0_i32_55] : memref<50x32xf32, #tpu.memory_space<any>> -> memref<1x32xf32, #tpu.memory_space<any>>
      %c3_i32_56 = arith.constant 3 : i32
      %c0_i32_57 = arith.constant 0 : i32
      %69 = tpu.memref_slice %arg9[%c3_i32_56, %c0_i32_57] : memref<8x32xf32, #tpu.memory_space<vmem>> -> memref<1x32xf32, #tpu.memory_space<vmem>>
      %70 = tpu.memref_slice %arg11[%c3_i32_54] : memref<6x!tpu.dma_semaphore, #tpu.memory_space<semaphore_mem>> -> memref<1x!tpu.dma_semaphore, #tpu.memory_space<semaphore_mem>>
      %71 = tpu.memref_squeeze %70 : memref<1x!tpu.dma_semaphore, #tpu.memory_space<semaphore_mem>> -> memref<!tpu.dma_semaphore, #tpu.memory_space<semaphore_mem>>
      tpu.wait_dma2 semaphore(%71 : memref<!tpu.dma_semaphore, #tpu.memory_space<semaphore_mem>>) src(%68 : memref<1x32xf32, #tpu.memory_space<any>>) dst(%69 : memref<1x32xf32, #tpu.memory_space<vmem>>)
      %c4_58 = arith.constant 4 : index
      %72 = memref.load %arg2[%c4_58] : memref<6xi32, #tpu.memory_space<smem>>
      %c4_i32_59 = arith.constant 4 : i32
      %c0_i32_60 = arith.constant 0 : i32
      %73 = tpu.memref_slice %arg3[%72, %c0_i32_60] : memref<50x32xf32, #tpu.memory_space<any>> -> memref<1x32xf32, #tpu.memory_space<any>>
      %c4_i32_61 = arith.constant 4 : i32
      %c0_i32_62 = arith.constant 0 : i32
      %74 = tpu.memref_slice %arg9[%c4_i32_61, %c0_i32_62] : memref<8x32xf32, #tpu.memory_space<vmem>> -> memref<1x32xf32, #tpu.memory_space<vmem>>
      %75 = tpu.memref_slice %arg11[%c4_i32_59] : memref<6x!tpu.dma_semaphore, #tpu.memory_space<semaphore_mem>> -> memref<1x!tpu.dma_semaphore, #tpu.memory_space<semaphore_mem>>
      %76 = tpu.memref_squeeze %75 : memref<1x!tpu.dma_semaphore, #tpu.memory_space<semaphore_mem>> -> memref<!tpu.dma_semaphore, #tpu.memory_space<semaphore_mem>>
      tpu.wait_dma2 semaphore(%76 : memref<!tpu.dma_semaphore, #tpu.memory_space<semaphore_mem>>) src(%73 : memref<1x32xf32, #tpu.memory_space<any>>) dst(%74 : memref<1x32xf32, #tpu.memory_space<vmem>>)
      %c5_63 = arith.constant 5 : index
      %77 = memref.load %arg2[%c5_63] : memref<6xi32, #tpu.memory_space<smem>>
      %c5_i32_64 = arith.constant 5 : i32
      %c0_i32_65 = arith.constant 0 : i32
      %78 = tpu.memref_slice %arg3[%77, %c0_i32_65] : memref<50x32xf32, #tpu.memory_space<any>> -> memref<1x32xf32, #tpu.memory_space<any>>
      %c5_i32_66 = arith.constant 5 : i32
      %c0_i32_67 = arith.constant 0 : i32
      %79 = tpu.memref_slice %arg9[%c5_i32_66, %c0_i32_67] : memref<8x32xf32, #tpu.memory_space<vmem>> -> memref<1x32xf32, #tpu.memory_space<vmem>>
      %80 = tpu.memref_slice %arg11[%c5_i32_64] : memref<6x!tpu.dma_semaphore, #tpu.memory_space<semaphore_mem>> -> memref<1x!tpu.dma_semaphore, #tpu.memory_space<semaphore_mem>>
      %81 = tpu.memref_squeeze %80 : memref<1x!tpu.dma_semaphore, #tpu.memory_space<semaphore_mem>> -> memref<!tpu.dma_semaphore, #tpu.memory_space<semaphore_mem>>
      tpu.wait_dma2 semaphore(%81 : memref<!tpu.dma_semaphore, #tpu.memory_space<semaphore_mem>>) src(%78 : memref<1x32xf32, #tpu.memory_space<any>>) dst(%79 : memref<1x32xf32, #tpu.memory_space<vmem>>)
      %c0_68 = arith.constant 0 : index
      %c0_69 = arith.constant 0 : index
      %82 = vector.load %arg9[%c0_68, %c0_69] : memref<8x32xf32, #tpu.memory_space<vmem>>, vector<8x32xf32>
      %83 = arith.truncf %82 : vector<8x32xf32> to vector<8x32xbf16>
      %c0_70 = arith.constant 0 : index
      %c0_71 = arith.constant 0 : index
      %84 = vector.load %arg10[%c0_70, %c0_71] : memref<8x32xbf16, #tpu.memory_space<vmem>>, vector<8x32xbf16>
      tpu.vector_store %arg10[%c0_70, %c0_71], %83 {strides = array<i32>} : memref<8x32xbf16, #tpu.memory_space<vmem>>, vector<8x32xbf16>,
      %cst_72 = arith.constant 0.000000e+00 : f32
      %85 = vector.broadcast %cst_72 : f32 to vector<8x128xf32>
      %c0_73 = arith.constant 0 : index
      %c0_74 = arith.constant 0 : index
      %86 = vector.load %arg8[%c0_73, %c0_74] : memref<8x128xf32, #tpu.memory_space<vmem>>, vector<8x128xf32>
      tpu.vector_store %arg8[%c0_73, %c0_74], %85 {strides = array<i32>} : memref<8x128xf32, #tpu.memory_space<vmem>>, vector<8x128xf32>,
    } else {
    }
    %c0 = arith.constant 0 : index
    %c0_1 = arith.constant 0 : index
    %3 = vector.load %arg10[%c0, %c0_1] : memref<8x32xbf16, #tpu.memory_space<vmem>>, vector<8x32xbf16>
    %c0_2 = arith.constant 0 : index
    %c0_3 = arith.constant 0 : index
    %4 = vector.load %arg4[%c0_2, %c0_3] : memref<32x384xbf16, #tpu.memory_space<vmem>>, vector<32x384xbf16>
    %cst = arith.constant dense<0.000000e+00> : vector<8x384xf32>
    %5 = tpu.matmul %3, %4, %cst {dimension_numbers = #tpu.dot_dimension_numbers<[1], [0], [0], [1], [0, 0, 1, 1], [], []>} : vector<8x32xbf16>, vector<32x384xbf16>, vector<8x384xf32> -> vector<8x384xf32>
    %c0_4 = arith.constant 0 : index
    %c0_5 = arith.constant 0 : index
    %6 = vector.load %arg5[%c0_4, %c0_5] : memref<1x384xf32, #tpu.memory_space<vmem>>, vector<1x384xf32>
    %7 = vector.broadcast %6 : vector<1x384xf32> to vector<8x384xf32>
    %8 = arith.addf %5, %7 : vector<8x384xf32>
    %cst_6 = arith.constant 0.000000e+00 : f32
    %9 = vector.broadcast %cst_6 : f32 to vector<8x384xf32>
    %10 = arith.maximumf %8, %9 : vector<8x384xf32>
    %11 = arith.truncf %10 : vector<8x384xf32> to vector<8x384xbf16>
    %c0_7 = arith.constant 0 : index
    %c0_8 = arith.constant 0 : index
    %12 = vector.load %arg8[%c0_7, %c0_8] : memref<8x128xf32, #tpu.memory_space<vmem>>, vector<8x128xf32>
    %c0_9 = arith.constant 0 : index
    %c0_10 = arith.constant 0 : index
    %13 = vector.load %arg6[%c0_9, %c0_10] : memref<384x128xbf16, #tpu.memory_space<vmem>>, vector<384x128xbf16>
    %cst_11 = arith.constant dense<0.000000e+00> : vector<8x128xf32>
    %14 = tpu.matmul %11, %13, %cst_11 {dimension_numbers = #tpu.dot_dimension_numbers<[1], [0], [0], [1], [0, 0, 1, 1], [], []>} : vector<8x384xbf16>, vector<384x128xbf16>, vector<8x128xf32> -> vector<8x128xf32>
    %15 = arith.addf %12, %14 : vector<8x128xf32>
    %c0_12 = arith.constant 0 : index
    %c0_13 = arith.constant 0 : index
    %16 = vector.load %arg8[%c0_12, %c0_13] : memref<8x128xf32, #tpu.memory_space<vmem>>, vector<8x128xf32>
    tpu.vector_store %arg8[%c0_12, %c0_13], %15 {strides = array<i32>} : memref<8x128xf32, #tpu.memory_space<vmem>>, vector<8x128xf32>,
    %c0_i32_14 = arith.constant 0 : i32
    %17 = arith.cmpi eq, %arg1, %c0_i32_14 : i32
    %18 = arith.extui %17 : i1 to i32
    %c0_i32_15 = arith.constant 0 : i32
    %19 = arith.cmpi ne, %18, %c0_i32_15 : i32
    scf.if %19 {
      %c0_16 = arith.constant 0 : index
      %c0_17 = arith.constant 0 : index
      %20 = vector.load %arg8[%c0_16, %c0_17] : memref<8x128xf32, #tpu.memory_space<vmem>>, vector<8x128xf32>
      %c0_18 = arith.constant 0 : index
      %c0_19 = arith.constant 0 : index
      %21 = vector.load %arg7[%c0_18, %c0_19] : memref<1x128xf32, #tpu.memory_space<vmem>>, vector<1x128xf32>
      %22 = vector.broadcast %21 : vector<1x128xf32> to vector<8x128xf32>
      %23 = arith.addf %20, %22 : vector<8x128xf32>
      %c0_20 = arith.constant 0 : index
      %c0_21 = arith.constant 0 : index
      %24 = vector.load %arg8[%c0_20, %c0_21] : memref<8x128xf32, #tpu.memory_space<vmem>>, vector<8x128xf32>
      tpu.vector_store %arg8[%c0_20, %c0_21], %23 {strides = array<i32>} : memref<8x128xf32, #tpu.memory_space<vmem>>, vector<8x128xf32>,
    } else {
    }
    return
  }
  func.func @transform_1(%arg0: i32, %arg1: i32, %arg2: memref<6xi32, #tpu.memory_space<smem>>) -> (i32, i32) {
    %c0_i32 = arith.constant 0 : i32
    %c0_i32_0 = arith.constant 0 : i32
    return %c0_i32, %arg1 : i32, i32
  }
  func.func @transform_2(%arg0: i32, %arg1: i32, %arg2: memref<6xi32, #tpu.memory_space<smem>>) -> (i32, i32) {
    %c0_i32 = arith.constant 0 : i32
    %c0_i32_0 = arith.constant 0 : i32
    return %c0_i32, %arg1 : i32, i32
  }
  func.func @transform_3(%arg0: i32, %arg1: i32, %arg2: memref<6xi32, #tpu.memory_space<smem>>) -> (i32, i32) {
    %c0_i32 = arith.constant 0 : i32
    return %arg1, %arg0 : i32, i32
  }
  func.func @transform_4(%arg0: i32, %arg1: i32, %arg2: memref<6xi32, #tpu.memory_space<smem>>) -> (i32, i32) {
    %c0_i32 = arith.constant 0 : i32
    %c0_i32_0 = arith.constant 0 : i32
    return %c0_i32, %arg0 : i32, i32
  }
  func.func @transform_5(%arg0: i32, %arg1: i32, %arg2: memref<6xi32, #tpu.memory_space<smem>>) -> (i32, i32) {
    %c0_i32 = arith.constant 0 : i32
    %c0_i32_0 = arith.constant 0 : i32
    return %c0_i32, %arg0 : i32, i32
  }
}

</mosaic_0001>

<bundles_post_ra>
// kernel: knowledge_prompting_forward.1
= control target key start
LH: loop header
LB: loop body
LE: loop exit
PB: predicated region body
PF: predicated region fallthrough
CT: control target
= control target key end

     0   :  { %s1222_s0 = inlined_call_operand.vmem [shape: s32[6], index: 0, kind: input, shape index: {}]   ;;  %s1223_s1 = inlined_call_operand.vmem [shape: f32[50,32], index: 1, kind: input, shape index: {}]   ;;  %s1224_s2 = inlined_call_operand.vmem [shape: bf16[32,384], index: 2, kind: input, shape index: {}]   ;;  %s1225_s3 = inlined_call_operand.vmem [shape: f32[1,384], index: 3, kind: input, shape index: {}]   ;;  %s1226_s4 = inlined_call_operand.hbm [shape: bf16[384,128], index: 4, kind: input, shape index: {}]   ;;  %s1227_s5 = inlined_call_operand.vmem [shape: f32[1,128], index: 5, kind: input, shape index: {}]   ;;  %s1228_s6 = inlined_call_operand.vmem [shape: f32[8,128], index: 6, kind: output, shape index: {}]  }
   0x1   :  { %s11_s23 = sshll.u32 %s1222_s0, 4  ;;  %s12_s23 = int_to_ptr.vmem [resolvable:$true] %s11_s23 }
   0x2   :  { %s1055_s24 = scalar_lea.vmem %s12_s23, 16  ;;  %p1060_p1 = scmp.lt.s32.totalorder %s12_s23, %s12_s23 }
   0x3   :  { %p1056_p0 = scmp.ne.s32.totalorder %s12_s23, %s1055_s24  ;;  %p1061_p2 = scmp.lt.s32.totalorder %s1055_s24, %s1055_s24 }
   0x5   :  { %p1062_p3 = por %p1061_p2, %p1060_p1 }
   0x7   :  { %p1063_p4 = pnand %p1062_p3, %p1056_p0 }
   0x9   :  { %1066 = shalt.err (!%p1063_p4)  }
   0xa   :  { %s1105_s25 = smov [#allocation6]  }
   0xb   :  { %14 = dma.vmem_to_smem %s12_s23, 16, %s1105_s25, [#allocation5] }
   0xc   :  { %1089 = dma.done.wait [#allocation5], 16 }
   0xd   :  { %1090 = vsyncadd [#allocation5], 4294967280 }
   0xe   :  { %16 = sfence }
   0xf   :  { %17 = vsyncpa [#allocation8], 0  ;;  %s1106_s26 = smov [#allocation7]   ;;  %s1067_s0 = scalar_lea.hbm %s1226_s4, 3072 }
  0x10   :  { %s27_s27 = sshll.u32 %s1106_s26, 4  ;;  %p1068_p5 = scmp.ne.s32.totalorder %s1226_s4, %s1067_s0  ;;  %s28_s27 = int_to_ptr.vmem [resolvable:$true] %s27_s27 }
  0x11   :  { %p1071_p6 = scmp.lt.u32.totalorder %s1067_s0, %s1226_s4 }
  0x13   :  { %p1073_p7 = pnand %p1071_p6, %p1068_p5 }
  0x15   :  { %1076 = shalt.err (!%p1073_p7)
}
  0x16   :  { %s1077_s10 = scalar_lea.vmem %s28_s27, 3072  ;;  %p1082_p9 = scmp.lt.s32.totalorder %s28_s27, %s28_s27 }
  0x17   :  { %p1078_p8 = scmp.ne.s32.totalorder %s28_s27, %s1077_s10  ;;  %p1083_p10 = scmp.lt.s32.totalorder %s1077_s10, %s1077_s10 }
  0x19   :  { %p1084_p11 = por %p1083_p10, %p1082_p9 }
  0x1b   :  { %p1085_p12 = pnand %p1084_p11, %p1078_p8 }
  0x1d   :  { %1088 = shalt.err (!%p1085_p12)
}
  0x1e   :  { %s1107_s11 = smov 64   ;;  %s1108_s12 = smov 4  }
  0x1f   :  { %33 = dma.hbm_to_vmem [thread:$0]  %s1226_s4, 3072, %s28_s27, [#allocation8], %s1107_s11, %s1107_s11, %s1108_s12  }
  0x20   :  { %1091 = dma.done.wait [#allocation8], 3072  }
  0x21   :  { %1092 = vsyncadd [#allocation8], 4294964224  ;;  %vm44_vm0 = vcmask 254976   ;;  %v1109_v0 = vmov 0.0   ;;  %s46_s15 = sld [smem:[#allocation6]] }
  0x22   :  { %45 = vst.msk [vmem:[#allocation2 + $0x6] sm:$0x3] %vm44_vm0, %v1109_v0 }
  0x27   :  { %s47_s18 = scalar_lea.vmem %s1223_s1, %s46_s15 }
  0x28   :  { %v65_v1 = vld [vmem:[%s47_s18] sm:$0x1] }
  0x29   :  { %66 = vst [vmem:[#allocation2] sm:$0x1] %v65_v1 }
  0x2a   :  { %91 = vsyncadd [#allocation4], 16  ;;  %s910_s19 = sld [smem:[#allocation6 + $0x1]] }
  0x30   :  { %s93_s22 = scalar_lea.vmem %s1223_s1, %s910_s19 }
  0x31   :  { %v113_v2 = vld [vmem:[%s93_s22] sm:$0x1] }
  0x32   :  { %114 = vst [vmem:[#allocation2 + $0x1] sm:$0x1] %v113_v2 }
  0x33   :  { %139 = vsyncadd [#allocation4 + $0x1], 16  ;;  %s911_s4 = sld [smem:[#allocation6 + $0x2]] }
  0x39   :  { %s141_s25 = scalar_lea.vmem %s1223_s1, %s911_s4 }
  0x3a   :  { %v161_v3 = vld [vmem:[%s141_s25] sm:$0x1] }
  0x3b   :  { %162 = vst [vmem:[#allocation2 + $0x2] sm:$0x1] %v161_v3 }
  0x3c   :  { %187 = vsyncadd [#allocation4 + $0x2], 16  ;;  %s912_s26 = sld [smem:[#allocation6 + $0x3]] }
  0x42   :  { %s189_s29 = scalar_lea.vmem %s1223_s1, %s912_s26 }
  0x43   :  { %v209_v4 = vld [vmem:[%s189_s29] sm:$0x1] }
  0x44   :  { %210 = vst [vmem:[#allocation2 + $0x3] sm:$0x1] %v209_v4 }
  0x45   :  { %235 = vsyncadd [#allocation4 + $0x3], 16  ;;  %s913_s0 = sld [smem:[#allocation6 + $0x4]] }
  0x4b   :  { %s237_s8 = scalar_lea.vmem %s1223_s1, %s913_s0 }
  0x4c   :  { %v257_v5 = vld [vmem:[%s237_s8] sm:$0x1] }
  0x4d   :  { %258 = vst [vmem:[#allocation2 + $0x4] sm:$0x1] %v257_v5 }
  0x4e   :  { %283 = vsyncadd [#allocation4 + $0x4], 16  ;;  %s914_s9 = sld [smem:[#allocation6 + $0x5]] }
  0x54   :  { %s285_s12 = scalar_lea.vmem %s1223_s1, %s914_s9 }
  0x55   :  { %v305_v6 = vld [vmem:[%s285_s12] sm:$0x1] }
  0x56   :  { %306 = vst [vmem:[#allocation2 + $0x5] sm:$0x1] %v305_v6 }
  0x57   :  { %331 = vsyncadd [#allocation4 + $0x5], 16 }
  0x58   :  { %1093 = dma.done.wait [#allocation4], 16 }
  0x59   :  { %1094 = vsyncadd [#allocation4], 4294967280 }
  0x5a   :  { %1095 = dma.done.wait [#allocation4 + $0x1], 16 }
  0x5b   :  { %1096 = vsyncadd [#allocation4 + $0x1], 4294967280 }
  0x5c   :  { %1097 = dma.done.wait [#allocation4 + $0x2], 16 }
  0x5d   :  { %1098 = vsyncadd [#allocation4 + $0x2], 4294967280 }
  0x5e   :  { %1099 = dma.done.wait [#allocation4 + $0x3], 16 }
  0x5f   :  { %1100 = vsyncadd [#allocation4 + $0x3], 4294967280 }
  0x60   :  { %1101 = dma.done.wait [#allocation4 + $0x4], 16 }
  0x61   :  { %1102 = vsyncadd [#allocation4 + $0x4], 4294967280 }
  0x62   :  { %1103 = dma.done.wait [#allocation4 + $0x5], 16 }
  0x63   :  { %1104 = vsyncadd [#allocation4 + $0x5], 4294967280  ;;  %988 = vmatprep.subr.bf16.mxu1 %v1109_v0  ;;  %v1110_v7 = vmov 0   ;;  %vm1111_vm1 = vmmov 0   ;;  %v1023_v8 = vld [vmem:[%s1224_s2 + $0x4] ss:$12 sps:$4 sm:$0xff]   ;;  %v367_v41 = vlaneseq }
  0x64   :  { %450 = vmatprep.mubr.bf16.mxu0 %v1110_v7  ;;  %992 = vmatprep.mubr.msk.bf16.mxu1 %vm1111_vm1, %v1109_v0  ;;  %v1025_v9 = vld [vmem:[%s1224_s2] ss:$12 sps:$4 sm:$0xff]   ;;  %v1026_v10 = vld [vmem:[%s1224_s2 + $0x8] ss:$12 sps:$4 sm:$0xff]   ;;  %v1029_v12 = vld [vmem:[%s1224_s2 + $0x18] ss:$12 sps:$4 sm:$0xff]  }
  0x65   :  { %418 = vmatprep.subr.bf16.mxu0 %v1023_v8  ;;  %v1027_v11 = vld [vmem:[%s1224_s2 + $0x1c] ss:$12 sps:$4 sm:$0xff]   ;;  %989 = vmatpush3.bf16.msra.mxu1 %v1026_v10  ;;  %v1030_v13 = vld [vmem:[%s1224_s2 + $0x20] ss:$12 sps:$4 sm:$0xff]   ;;  %vm353_vm2 = vcmask 257024   ;;  %vm414_vm3 = vcmask 261120  }
  0x66   :  { %419 = vmatpush1.bf16.msra.mxu0 %v1025_v9  ;;  %v351_v14 = vld [vmem:[#allocation2] sm:$0xff]  ;;  %990 = vmatprep.subr.bf16.mxu1 %v1109_v0  ;;  %v1031_v16 = vld [vmem:[#allocation7 + $0x40] sm:$0xff]   ;;  %v1034_v19 = vld [vmem:[#allocation7 + $0x48] sm:$0xff]   ;;  %v368_v42 = vshrl.u32 %v367_v41, 7 }
  0x67   :  { %420 = vmatprep.subr.bf16.mxu0 %v1027_v11  ;;  %v352_v15 = vpack.c.bf16 %v351_v14, %v351_v14  ;;  %v1032_v17 = vld [vmem:[#allocation7] sm:$0xff]   ;;  %v1035_v21 = vld [vmem:[#allocation7 + $0x8] sm:$0xff]   ;;  %v1037_v23 = vld [vmem:[#allocation7 + $0x50] sm:$0xff]  }
  0x68   :  { %v1033_v18 = vld [vmem:[#allocation7 + $0x80] sm:$0xff]   ;;  %v1036_v22 = vld [vmem:[#allocation7 + $0x88] sm:$0xff]   ;;  %v1038_v24 = vld [vmem:[#allocation7 + $0x10] sm:$0xff]   ;;  %v369_v43 = vsub.s32 0, %v368_v42  ;;  %v377_v44 = vsub.s32 2, %v368_v42  ;;  %v373_v46 = vsub.s32 1, %v368_v42 }
  0x69   :  { %354 = vst.msk [vmem:[#allocation3] sm:$0xf] %vm353_vm2, %v352_v15  ;;  %991 = vmatpush3.bf16.msra.mxu1 %v1030_v13  ;;  %v1039_v25 = vld [vmem:[#allocation7 + $0x90] sm:$0xff]   ;;  %v1040_v26 = vld [vmem:[#allocation7 + $0x58] sm:$0xff]   ;;  %v1043_v29 = vld [vmem:[#allocation7 + $0x60] sm:$0xff]  }
  0x6a   :  { %421 = vmatpush1.bf16.msra.mxu0 %v1029_v12  ;;  %996 = vmatprep.subr.bf16.mxu1 %v1109_v0  ;;  %v1041_v27 = vld [vmem:[#allocation7 + $0x18] sm:$0xff]   ;;  %v1044_v30 = vld [vmem:[#allocation7 + $0x20] sm:$0xff]   ;;  %v1046_v32 = vld [vmem:[#allocation7 + $0x68] sm:$0xff]  }
  0x6b   :  { %957 = vmatprep.subr.bf16.mxu0 %v1031_v16  ;;  %v1042_v28 = vld [vmem:[#allocation7 + $0x98] sm:$0xff]   ;;  %v1045_v31 = vld [vmem:[#allocation7 + $0xa0] sm:$0xff]   ;;  %v1047_v33 = vld [vmem:[#allocation7 + $0x28] sm:$0xff]  }
  0x6c   :  { %v1048_v34 = vld [vmem:[#allocation7 + $0xa8] sm:$0xff]   ;;  %v1049_v35 = vld [vmem:[#allocation7 + $0x70] sm:$0xff]   ;;  %v1052_v38 = vld [vmem:[#allocation7 + $0x78] sm:$0xff]  }
  0x6d   :  { %v1050_v36 = vld [vmem:[#allocation7 + $0x30] sm:$0xff]   ;;  %v1053_v39 = vld [vmem:[#allocation7 + $0x38] sm:$0xff]  }
  0x6e   :  { %v1051_v37 = vld [vmem:[#allocation7 + $0xb0] sm:$0xff]   ;;  %v1054_v40 = vld [vmem:[#allocation7 + $0xb8] sm:$0xff]  }
  0x6f   :  { %v365_v45 = vld [vmem:[%s1225_s3] sm:$0x7] }
  0x70   :  { %v356_v20 = vld [vmem:[#allocation3] sm:$0xf]  ;;  %v370_v47 = vrot.slane %v365_v45, %v369_v43  ;;  %v378_v48 = vrot.slane %v365_v45, %v377_v44  ;;  %v374_v49 = vrot.slane %v365_v45, %v373_v46  ;;  %v947_v13 = vld [vmem:[%s1227_s5] ss:$0 sm:$0xff] }
  0x71   :  { %921 = vmatmul.mubr.msk.bf16.vlgmr.msra.gmra.mrb[0].mxu0 %vm414_vm3, %v356_v20  ;;  %993 = vmatmul.mubr.msk.bf16.vlgmr.msra.gmra.mrb[0].mxu1 %vm414_vm3, %v356_v20 }
  0x72   :  { %958 = vmatpush3.bf16.msra.mxu0 %v1032_v17  ;;  %997 = vmatpush3.bf16.msra.mxu1 %v1033_v18 }
  0x73   :  { %959 = vmatprep.subr.bf16.mxu0 %v1034_v19  ;;  %998 = vmatprep.subr.bf16.mxu1 %v1109_v0 }
  0x74   :  { %1012 = vmatprep.mubr.msk.bf16.mxu1 %vm1111_vm1, %v1109_v0 }
  0x76   :  { %960 = vmatpush3.bf16.msra.mxu0 %v1035_v21  ;;  %999 = vmatpush3.bf16.msra.mxu1 %v1036_v22 }
  0x77   :  { %961 = vmatprep.subr.bf16.mxu0 %v1037_v23  ;;  %1000 = vmatprep.subr.bf16.mxu1 %v1109_v0 }
  0x7a   :  { %962 = vmatpush3.bf16.msra.mxu0 %v1038_v24  ;;  %1001 = vmatpush3.bf16.msra.mxu1 %v1039_v25 }
  0x7b   :  { %963 = vmatprep.subr.bf16.mxu0 %v1040_v26  ;;  %1002 = vmatprep.subr.bf16.mxu1 %v1109_v0 }
  0x7e   :  { %964 = vmatpush3.bf16.msra.mxu0 %v1041_v27  ;;  %1003 = vmatpush3.bf16.msra.mxu1 %v1042_v28 }
  0x7f   :  { %965 = vmatprep.subr.bf16.mxu0 %v1043_v29  ;;  %1004 = vmatprep.subr.bf16.mxu1 %v1109_v0 }
  0x82   :  { %966 = vmatpush3.bf16.msra.mxu0 %v1044_v30  ;;  %1005 = vmatpush3.bf16.msra.mxu1 %v1045_v31 }
  0x83   :  { %967 = vmatprep.subr.bf16.mxu0 %v1046_v32  ;;  %1006 = vmatprep.subr.bf16.mxu1 %v1109_v0 }
  0x86   :  { %968 = vmatpush3.bf16.msra.mxu0 %v1047_v33  ;;  %1007 = vmatpush3.bf16.msra.mxu1 %v1048_v34 }
  0x87   :  { %1008 = vmatprep.subr.bf16.mxu1 %v1109_v0  ;;  %969 = vmatprep.subr.bf16.mxu0 %v1049_v35 }
  0x8a   :  { %970 = vmatpush3.bf16.msra.mxu0 %v1050_v36  ;;  %1009 = vmatpush3.bf16.msra.mxu1 %v1051_v37 }
  0x8b   :  { %1010 = vmatprep.subr.bf16.mxu1 %v1109_v0  ;;  %971 = vmatprep.subr.bf16.mxu0 %v1052_v38 }
  0x8e   :  { %972 = vmatpush3.bf16.msra.mxu0 %v1053_v39  ;;  %1011 = vmatpush3.bf16.msra.mxu1 %v1054_v40 }
 0x144   :  { %v452_v50 = vpop.f32.mrb[0].mxu0  ;;  %v493_v51 = vpop.f32.mrb[0].mxu1 }
 0x145   :  { %v453_v52 = vadd.f32 %v452_v50, %v370_v47  ;;  %v454_v53 = vpop.f32.mrb[1].mxu0  ;;  %v494_v54 = vadd.f32 %v493_v51, %v378_v48  ;;  %v994_v55 = vpop.f32.mrb[1].mxu1 }
 0x146   :  { %v455_v56 = vadd.f32 %v454_v53, %v374_v49  ;;  %v456_v57 = vpop.f32.mrb[2].mxu0  ;;  %v496_v58 = vpop.f32.mrb[2].mxu1 }
 0x147   :  { %v499_v59 = vmax.f32 %v453_v52, 0.0  ;;  %v501_v60 = vmax.f32 %v494_v54, 0.0  ;;  %v457_v61 = vpop.f32.mrb[3].mxu0  ;;  %v995_v62 = vpop.f32.mrb[3].mxu1 }
 0x148   :  { %v500_v63 = vmax.f32 %v455_v56, 0.0 }
 0x149   :  { %v504_v0 = vpack.c.bf16 %v501_v60, %v501_v60  ;;  %v502_v2 = vpack.c.bf16 %v499_v59, %v499_v59 }
 0x14a   :  { %v503_v1 = vpack.c.bf16 %v500_v63, %v500_v63 }
 0x14b   :  { %1013 = vmatmul.mubr.bf16.vlgmr.msra.gmra.mrb[4].mxu1 %v504_v0 }
 0x14c   :  { %730 = vmatprep.mubr.bf16.mxu0 %v503_v1 }
 0x14d   :  { %731 = vmatmul.mubr.bf16.vlgmr.msra.gmra.mrb[4].mxu0 %v502_v2 }
 0x21e   :  { %v772_v3 = vpop.f32.mrb[4].mxu1 }
 0x21f   :  { %v1014_v4 = vpop.f32.mrb[5].mxu1 }
 0x220   :  { %v973_v5 = vpop.f32.mrb[4].mxu0  ;;  %v775_v6 = vpop.f32.mrb[6].mxu1 }
 0x221   :  { %v974_v7 = vpop.f32.mrb[5].mxu0  ;;  %v1015_v8 = vpop.f32.mrb[7].mxu1 }
 0x222   :  { %v975_v9 = vadd.f32 %v974_v7, %v973_v5  ;;  %v976_v10 = vpop.f32.mrb[6].mxu0 }
 0x223   :  { %v977_v11 = vpop.f32.mrb[7].mxu0 }
 0x224   :  { %v773_v12 = vadd.f32 %v975_v9, %v772_v3 }
 0x226   :  { %v791_v14 = vadd.f32 %v947_v13, %v773_v12 }
 0x228   :  { %792 = vst [vmem:[%s1228_s6] sm:$0xff] %v791_v14 }
 0x229   :  { %797 = vsyncpa [#allocation8], 1 }
 0x22a   :  { %798 = vsyncmov [#allocation4] }
 0x22d   :  { %s799_s27 = vpop.sfrf %798 }
 0x22e   :  { %p948_p13 = scmp.ne.s32.totalorder %s799_s27, 0 }
 0x230   :  { %803 = shalt.err (%p948_p13)  }
 0x231   :  { %805 = vsyncmov [#allocation4 + $0x1] }
 0x234   :  { %s806_s28 = vpop.sfrf %805 }
 0x235   :  { %p949_p0 = scmp.ne.s32.totalorder %s806_s28, 0 }
 0x237   :  { %810 = shalt.err (%p949_p0)  }
 0x238   :  { %812 = vsyncmov [#allocation4 + $0x2] }
 0x23b   :  { %s813_s29 = vpop.sfrf %812 }
 0x23c   :  { %p950_p1 = scmp.ne.s32.totalorder %s813_s29, 0 }
 0x23e   :  { %817 = shalt.err (%p950_p1)  }
 0x23f   :  { %819 = vsyncmov [#allocation4 + $0x3] }
 0x242   :  { %s820_s5 = vpop.sfrf %819 }
 0x243   :  { %p951_p2 = scmp.ne.s32.totalorder %s820_s5, 0 }
 0x245   :  { %824 = shalt.err (%p951_p2)  }
 0x246   :  { %826 = vsyncmov [#allocation4 + $0x4] }
 0x249   :  { %s827_s0 = vpop.sfrf %826 }
 0x24a   :  { %p952_p3 = scmp.ne.s32.totalorder %s827_s0, 0 }
 0x24c   :  { %831 = shalt.err (%p952_p3)  }
 0x24d   :  { %833 = vsyncmov [#allocation4 + $0x5] }
 0x250   :  { %s834_s6 = vpop.sfrf %833 }
 0x251   :  { %p953_p4 = scmp.ne.s32.totalorder %s834_s6, 0 }
 0x253   :  { %838 = shalt.err (%p953_p4)  }

</bundles_post_ra>
